<compile_context>
chip_gen: v6e
topology: v6e:2x2x1
jax: 0.10.0
libtpu: 0.0.40
codegen_flags: <defaults>
</compile_context>

<pallas_src>
import functools

import jax
import jax.numpy as jnp
from jax.experimental import pallas as pl
from jax.experimental.pallas import tpu as pltpu


_TAPS = ((-1, -1), (-1, 0), (-1, 1),
         (0, -1), (0, 0), (0, 1),
         (1, -1), (1, 0), (1, 1))


def _inputproj_kernel(x_ref, m_ref, w_ref, b_ref, o_ref, patch_ref, *,
                      cin, img_w, halo_pad, pt, k, kp, nb, slope):
    """One grid step: Nb images x one pixel tile.

    x_ref    : (Nb, 1, Cin, Wt)  bf16  halo'd flat-pixel windows (pixels on lanes)
    m_ref    : (2, Pt)           bf16  row 0: valid for dx=-1, row 1: valid for dx=+1
    w_ref    : (Cout, Kp)        bf16  fused 3x3 weight (tap-major, K zero-padded to Kp)
    b_ref    : (Cout, 1)         f32   bias
    o_ref    : (Nb, Cout, Pt)    out dtype, pixels on lanes
    patch_ref: (Kp, Pt)          f32   VMEM scratch holding the im2col slab
    """
    w = w_ref[...].astype(jnp.float32)          # tiny; hoisted out of the image loop
    b = b_ref[...]
    m_left = m_ref[0:1, :]
    m_right = m_ref[1:2, :]

    if kp > k:
        # zero the K-padding rows once per step (weight columns there are zero too)
        patch_ref[k:, :] = jnp.zeros((kp - k, pt), dtype=patch_ref.dtype)

    def one_image(i, carry):
        # build the (K, Pt) patch slab from 9 statically shifted lane slices
        for t, (dy, dx) in enumerate(_TAPS):
            off = halo_pad + dy * img_w + dx            # static offset into the halo window
            win = x_ref[i, 0, :, off:off + pt]          # (Cin, Pt) bf16
            if dx == -1:
                win = win * m_left                      # zero the wrapped-around column
            elif dx == 1:
                win = win * m_right
            patch_ref[t * cin:(t + 1) * cin, :] = win.astype(patch_ref.dtype)

        # one wide MXU contraction per image, f32 accumulation
        acc = jnp.dot(w, patch_ref[...], preferred_element_type=jnp.float32)  # (Cout, Pt)
        acc = acc + b
        acc = jnp.where(acc > 0, acc, slope * acc)      # LeakyReLU(0.01)
        o_ref[i] = acc.astype(o_ref.dtype)
        return carry

    if nb == 1:
        one_image(0, 0)
    else:
        jax.lax.fori_loop(0, nb, one_image, 0)


def _round_up(a, m):
    return -(-a // m) * m


def _largest_divisor_at_most(n, cap):
    cap = max(1, min(cap, n))
    for d in range(cap, 0, -1):
        if n % d == 0:
            return d
    return 1


def _vmem_budgets():
    """Return (vmem_limit cap, per-step block budget) with per-chip headroom."""
    cap = 64 << 20                                   # conservative default (v7x per-core VMEM)
    try:
        info = pltpu.get_tpu_info()
        cap = int(getattr(info, "vmem_capacity_bytes", cap))
    except Exception:
        pass
    vmem_cap = max(32 << 20, cap - (16 << 20))       # v7x -> ~48 MiB, v5e/v6e -> ~112 MiB
    block_budget = max(8 << 20, min(16 << 20, (vmem_cap - (8 << 20)) // 3))
    return vmem_cap, block_budget


def _pick_nb(n, cap, n_ptiles):
    """Largest divisor of n <= cap, preferring an even total grid-step count >= 2."""
    divs = [d for d in range(1, max(1, min(cap, n)) + 1) if n % d == 0]
    divs.sort(reverse=True)
    for d in divs:                                   # even step count keeps v7x's 2 TCs balanced
        steps = (n // d) * n_ptiles
        if steps >= 2 and steps % 2 == 0:
            return d
    for d in divs:
        if (n // d) * n_ptiles >= 2:
            return d
    return divs[0] if divs else 1


@functools.partial(jax.jit, static_argnames=("out_dtype",))
def input_proj(x, weight, bias, out_dtype=jnp.float32):
    """InputProj forward.

    x      : (B, T, Cin, H, W)  float32
    weight : (Cout, Cin, 3, 3)  float32  (PyTorch Conv2d layout)
    bias   : (Cout,)            float32
    returns: (B, T, Cout, H, W) out_dtype (float32 by default, matching the module)
    """
    B, T, Cin, H, W = x.shape
    Cout = weight.shape[0]
    N = B * T
    P = H * W
    K = 9 * Cin
    Kp = _round_up(K, 8)                      # pad contraction dim in the f32 scratch
    out_bytes = jnp.dtype(out_dtype).itemsize
    slope = 0.01                              # PyTorch LeakyReLU default

    vmem_cap, block_budget = _vmem_budgets()

    # ---- tiling: pixels on lanes, always a 128-multiple ----
    halo = W + 1                              # max |flat shift| of a 3x3 tap
    halo_pad = _round_up(halo, 128)
    P_pad = _round_up(P, 128)

    per_px = Cout * out_bytes + Cin * 2 + Kp * 4          # per-step bytes per pixel (Nb = 1)
    pt_cap = max(128, (block_budget // per_px) // 128 * 128)
    Pt = 128 * _largest_divisor_at_most(P_pad // 128, pt_cap // 128)
    n_ptiles = P_pad // Pt
    Wt = Pt + 2 * halo_pad
    E = P_pad + 2 * halo_pad

    per_img = Cin * Wt * 2 + Cout * Pt * out_bytes
    avail = block_budget - Kp * Pt * 4 - 2 * Pt * 2
    nb_cap = max(1, min(8, avail // max(1, per_img)))
    Nb = _pick_nb(N, nb_cap, n_ptiles)
    grid = (N // Nb, n_ptiles)

    # ---- inputs: bf16 flat-pixel layout with zero halo; NO HBM im2col ----
    xf = x.reshape(N, Cin, P).astype(jnp.bfloat16)
    x_ext = jnp.pad(xf, ((0, 0), (0, 0), (halo_pad, E - halo_pad - P)))
    if n_ptiles == 1:
        x_win = x_ext[:, None]                              # (N, 1, Cin, E == Wt)
    else:
        # overlapping halo'd windows for large frames (duplicates only 2*halo_pad per tile)
        idx = (jnp.arange(n_ptiles) * Pt)[:, None] + jnp.arange(Wt)[None, :]
        x_win = jnp.transpose(x_ext[:, :, idx], (0, 2, 1, 3))   # (N, n_ptiles, Cin, Wt)

    # row-edge validity masks for the dx = -1 / +1 taps (precomputed; no in-kernel mod)
    col = jnp.arange(P_pad, dtype=jnp.int32) % W
    masks = jnp.stack([col != 0, col != (W - 1)]).astype(jnp.bfloat16)       # (2, P_pad)

    # weight: (Cout, Cin, 3, 3) -> (Cout, (ky, kx, Cin)) tap-major, zero-padded K -> Kp
    w2 = jnp.transpose(weight, (0, 2, 3, 1)).reshape(Cout, K)
    w2 = jnp.pad(w2, ((0, 0), (0, Kp - K))).astype(jnp.bfloat16)
    b2 = bias.reshape(Cout, 1).astype(jnp.float32)

    block_bytes = (Nb * Cin * Wt * 2 + Nb * Cout * Pt * out_bytes
                   + Kp * Pt * 4 + 2 * Pt * 2 + Cout * Kp * 2 + Cout * 4)
    vmem_limit = int(min(max(2 * block_bytes + (4 << 20), 32 << 20), vmem_cap))

    out = pl.pallas_call(
        functools.partial(_inputproj_kernel, cin=Cin, img_w=W, halo_pad=halo_pad,
                          pt=Pt, k=K, kp=Kp, nb=Nb, slope=slope),
        out_shape=jax.ShapeDtypeStruct((N, Cout, P_pad), out_dtype),
        grid=grid,
        in_specs=[
            pl.BlockSpec((Nb, 1, Cin, Wt), lambda n, j: (n, j, 0, 0)),
            pl.BlockSpec((2, Pt), lambda n, j: (0, j)),
            pl.BlockSpec((Cout, Kp), lambda n, j: (0, 0)),
            pl.BlockSpec((Cout, 1), lambda n, j: (0, 0)),
        ],
        out_specs=pl.BlockSpec((Nb, Cout, Pt), lambda n, j: (n, 0, j)),
        scratch_shapes=[pltpu.VMEM((Kp, Pt), jnp.float32)],
        compiler_params=pltpu.CompilerParams(
            dimension_semantics=("parallel", "parallel"),
            vmem_limit_bytes=vmem_limit),
    )(x_win, masks, w2, b2)

    if P_pad != P:
        out = out[:, :, :P]
    # free reshape back to the PyTorch layout
    return out.reshape(B, T, Cout, H, W)


def _reference(x, weight, bias):
    """Pure-JAX reference using the same bf16 inputs / f32 accumulation."""
    B, T, Cin, H, W = x.shape
    xr = x.reshape(B * T, Cin, H, W).astype(jnp.bfloat16)
    wr = weight.astype(jnp.bfloat16)
    y = jax.lax.conv_general_dilated(
        xr, wr, window_strides=(1, 1), padding="SAME",
        dimension_numbers=("NCHW", "OIHW", "NCHW"),
        preferred_element_type=jnp.float32)
    y = y + bias[None, :, None, None]
    y = jnp.where(y > 0, y, 0.01 * y)
    return y.reshape(B, T, -1, H, W)


if __name__ == "__main__":
    key = jax.random.PRNGKey(0)
    k_x, k_w, k_b = jax.random.split(key, 3)

    B, T, Cin, H, W = 2, 2, 3, 16, 16
    Cout = 32

    x = jax.random.normal(k_x, (B, T, Cin, H, W), dtype=jnp.float32)
    # deterministic synthetic Conv2d(Cin, Cout, 3) parameters
    fan_in = Cin * 3 * 3
    bound = 1.0 / (fan_in ** 0.5)
    weight = jax.random.uniform(k_w, (Cout, Cin, 3, 3), jnp.float32,
                                minval=-bound, maxval=bound)
    bias = jax.random.uniform(k_b, (Cout,), jnp.float32,
                              minval=-bound, maxval=bound)

    out = jax.block_until_ready(input_proj(x, weight, bias))
    ref = _reference(x, weight, bias)

    assert out.shape == (B, T, Cout, H, W), out.shape
    err = float(jnp.max(jnp.abs(out - ref)))
    assert jnp.allclose(out, ref, atol=2e-3, rtol=2e-3), err

    print("KERNEL_OK")
</pallas_src>

<mosaic_0001>
module attributes {stable_mosaic.version = 11 : i64} {
  func.func @_inputproj_kernel(%arg0: i32, %arg1: i32, %arg2: memref<2x1x3x512xbf16, #tpu.memory_space<vmem>>, %arg3: memref<2x256xbf16, #tpu.memory_space<vmem>>, %arg4: memref<32x32xbf16, #tpu.memory_space<vmem>>, %arg5: memref<32x1xf32, #tpu.memory_space<vmem>>, %arg6: memref<2x32x256xf32, #tpu.memory_space<vmem>>, %arg7: memref<32x256xf32, #tpu.memory_space<vmem>>) attributes {dimension_semantics = [#tpu.dimension_semantics<parallel>, #tpu.dimension_semantics<parallel>], iteration_bounds = array<i64: 2, 1>, scalar_prefetch = 0 : i64, scratch_operands = 1 : i64, tpu.core_type = #tpu.core_type<tc>, window_params = [{transform_indices = @transform_0, window_bounds = array<i64: 2, 1, 3, 512>}, {transform_indices = @transform_1, window_bounds = array<i64: 2, 256>}, {pipeline_mode = #tpu.pipeline_mode<synchronous>, transform_indices = @transform_2, window_bounds = array<i64: 32, 32>}, {pipeline_mode = #tpu.pipeline_mode<synchronous>, transform_indices = @transform_3, window_bounds = array<i64: 32, 1>}, {transform_indices = @transform_4, window_bounds = array<i64: 2, 32, 256>}]} {
    %c0 = arith.constant 0 : index
    %c0_0 = arith.constant 0 : index
    %0 = vector.load %arg4[%c0, %c0_0] : memref<32x32xbf16, #tpu.memory_space<vmem>>, vector<32x32xbf16>
    %1 = arith.extf %0 : vector<32x32xbf16> to vector<32x32xf32>
    %c0_1 = arith.constant 0 : index
    %c0_2 = arith.constant 0 : index
    %2 = vector.load %arg5[%c0_1, %c0_2] : memref<32x1xf32, #tpu.memory_space<vmem>>, vector<32x1xf32>
    %c0_3 = arith.constant 0 : index
    %c0_4 = arith.constant 0 : index
    %3 = vector.load %arg3[%c0_3, %c0_4] : memref<2x256xbf16, #tpu.memory_space<vmem>>, vector<1x256xbf16>
    %c1 = arith.constant 1 : index
    %c0_5 = arith.constant 0 : index
    %4 = vector.load %arg3[%c1, %c0_5] : memref<2x256xbf16, #tpu.memory_space<vmem>>, vector<1x256xbf16>
    %cst = arith.constant 0.000000e+00 : f32
    %5 = vector.broadcast %cst : f32 to vector<5x256xf32>
    %c27 = arith.constant 27 : index
    %c0_6 = arith.constant 0 : index
    %6 = vector.load %arg7[%c27, %c0_6] : memref<32x256xf32, #tpu.memory_space<vmem>>, vector<5x256xf32>
    tpu.vector_store %arg7[%c27, %c0_6], %5 {strides = array<i32>} : memref<32x256xf32, #tpu.memory_space<vmem>>, vector<5x256xf32>,
    %c0_i32 = arith.constant 0 : i32
    %c2_i32 = arith.constant 2 : i32
    %7 = arith.addi %c0_i32, %c2_i32 : i32
    %c1_i32 = arith.constant 1 : i32
    scf.for %arg8 = %c0_i32 to %7 step %c1_i32  : i32 {
      %8 = arith.index_cast %arg8 : i32 to index
      %c0_8 = arith.constant 0 : index
      %c0_9 = arith.constant 0 : index
      %c111 = arith.constant 111 : index
      %9 = vector.load %arg2[%8, %c0_8, %c0_9, %c111] : memref<2x1x3x512xbf16, #tpu.memory_space<vmem>>, vector<1x1x3x256xbf16>
      %10 = vector.shape_cast %9 : vector<1x1x3x256xbf16> to vector<3x256xbf16>
      %11 = vector.broadcast %3 : vector<1x256xbf16> to vector<3x256xbf16>
      %12 = arith.mulf %10, %11 : vector<3x256xbf16>
      %13 = arith.extf %12 : vector<3x256xbf16> to vector<3x256xf32>
      %c0_10 = arith.constant 0 : index
      %c0_11 = arith.constant 0 : index
      %14 = vector.load %arg7[%c0_10, %c0_11] : memref<32x256xf32, #tpu.memory_space<vmem>>, vector<3x256xf32>
      tpu.vector_store %arg7[%c0_10, %c0_11], %13 {strides = array<i32>} : memref<32x256xf32, #tpu.memory_space<vmem>>, vector<3x256xf32>,
      %15 = arith.index_cast %arg8 : i32 to index
      %c0_12 = arith.constant 0 : index
      %c0_13 = arith.constant 0 : index
      %c112 = arith.constant 112 : index
      %16 = vector.load %arg2[%15, %c0_12, %c0_13, %c112] : memref<2x1x3x512xbf16, #tpu.memory_space<vmem>>, vector<1x1x3x256xbf16>
      %17 = vector.shape_cast %16 : vector<1x1x3x256xbf16> to vector<3x256xbf16>
      %18 = arith.extf %17 : vector<3x256xbf16> to vector<3x256xf32>
      %c3 = arith.constant 3 : index
      %c0_14 = arith.constant 0 : index
      %19 = vector.load %arg7[%c3, %c0_14] : memref<32x256xf32, #tpu.memory_space<vmem>>, vector<3x256xf32>
      tpu.vector_store %arg7[%c3, %c0_14], %18 {strides = array<i32>} : memref<32x256xf32, #tpu.memory_space<vmem>>, vector<3x256xf32>,
      %20 = arith.index_cast %arg8 : i32 to index
      %c0_15 = arith.constant 0 : index
      %c0_16 = arith.constant 0 : index
      %c113 = arith.constant 113 : index
      %21 = vector.load %arg2[%20, %c0_15, %c0_16, %c113] : memref<2x1x3x512xbf16, #tpu.memory_space<vmem>>, vector<1x1x3x256xbf16>
      %22 = vector.shape_cast %21 : vector<1x1x3x256xbf16> to vector<3x256xbf16>
      %23 = vector.broadcast %4 : vector<1x256xbf16> to vector<3x256xbf16>
      %24 = arith.mulf %22, %23 : vector<3x256xbf16>
      %25 = arith.extf %24 : vector<3x256xbf16> to vector<3x256xf32>
      %c6 = arith.constant 6 : index
      %c0_17 = arith.constant 0 : index
      %26 = vector.load %arg7[%c6, %c0_17] : memref<32x256xf32, #tpu.memory_space<vmem>>, vector<3x256xf32>
      tpu.vector_store %arg7[%c6, %c0_17], %25 {strides = array<i32>} : memref<32x256xf32, #tpu.memory_space<vmem>>, vector<3x256xf32>,
      %27 = arith.index_cast %arg8 : i32 to index
      %c0_18 = arith.constant 0 : index
      %c0_19 = arith.constant 0 : index
      %c127 = arith.constant 127 : index
      %28 = vector.load %arg2[%27, %c0_18, %c0_19, %c127] : memref<2x1x3x512xbf16, #tpu.memory_space<vmem>>, vector<1x1x3x256xbf16>
      %29 = vector.shape_cast %28 : vector<1x1x3x256xbf16> to vector<3x256xbf16>
      %30 = vector.broadcast %3 : vector<1x256xbf16> to vector<3x256xbf16>
      %31 = arith.mulf %29, %30 : vector<3x256xbf16>
      %32 = arith.extf %31 : vector<3x256xbf16> to vector<3x256xf32>
      %c9 = arith.constant 9 : index
      %c0_20 = arith.constant 0 : index
      %33 = vector.load %arg7[%c9, %c0_20] : memref<32x256xf32, #tpu.memory_space<vmem>>, vector<3x256xf32>
      tpu.vector_store %arg7[%c9, %c0_20], %32 {strides = array<i32>} : memref<32x256xf32, #tpu.memory_space<vmem>>, vector<3x256xf32>,
      %34 = arith.index_cast %arg8 : i32 to index
      %c0_21 = arith.constant 0 : index
      %c0_22 = arith.constant 0 : index
      %c128 = arith.constant 128 : index
      %35 = vector.load %arg2[%34, %c0_21, %c0_22, %c128] : memref<2x1x3x512xbf16, #tpu.memory_space<vmem>>, vector<1x1x3x256xbf16>
      %36 = vector.shape_cast %35 : vector<1x1x3x256xbf16> to vector<3x256xbf16>
      %37 = arith.extf %36 : vector<3x256xbf16> to vector<3x256xf32>
      %c12 = arith.constant 12 : index
      %c0_23 = arith.constant 0 : index
      %38 = vector.load %arg7[%c12, %c0_23] : memref<32x256xf32, #tpu.memory_space<vmem>>, vector<3x256xf32>
      tpu.vector_store %arg7[%c12, %c0_23], %37 {strides = array<i32>} : memref<32x256xf32, #tpu.memory_space<vmem>>, vector<3x256xf32>,
      %39 = arith.index_cast %arg8 : i32 to index
      %c0_24 = arith.constant 0 : index
      %c0_25 = arith.constant 0 : index
      %c129 = arith.constant 129 : index
      %40 = vector.load %arg2[%39, %c0_24, %c0_25, %c129] : memref<2x1x3x512xbf16, #tpu.memory_space<vmem>>, vector<1x1x3x256xbf16>
      %41 = vector.shape_cast %40 : vector<1x1x3x256xbf16> to vector<3x256xbf16>
      %42 = vector.broadcast %4 : vector<1x256xbf16> to vector<3x256xbf16>
      %43 = arith.mulf %41, %42 : vector<3x256xbf16>
      %44 = arith.extf %43 : vector<3x256xbf16> to vector<3x256xf32>
      %c15 = arith.constant 15 : index
      %c0_26 = arith.constant 0 : index
      %45 = vector.load %arg7[%c15, %c0_26] : memref<32x256xf32, #tpu.memory_space<vmem>>, vector<3x256xf32>
      tpu.vector_store %arg7[%c15, %c0_26], %44 {strides = array<i32>} : memref<32x256xf32, #tpu.memory_space<vmem>>, vector<3x256xf32>,
      %46 = arith.index_cast %arg8 : i32 to index
      %c0_27 = arith.constant 0 : index
      %c0_28 = arith.constant 0 : index
      %c143 = arith.constant 143 : index
      %47 = vector.load %arg2[%46, %c0_27, %c0_28, %c143] : memref<2x1x3x512xbf16, #tpu.memory_space<vmem>>, vector<1x1x3x256xbf16>
      %48 = vector.shape_cast %47 : vector<1x1x3x256xbf16> to vector<3x256xbf16>
      %49 = vector.broadcast %3 : vector<1x256xbf16> to vector<3x256xbf16>
      %50 = arith.mulf %48, %49 : vector<3x256xbf16>
      %51 = arith.extf %50 : vector<3x256xbf16> to vector<3x256xf32>
      %c18 = arith.constant 18 : index
      %c0_29 = arith.constant 0 : index
      %52 = vector.load %arg7[%c18, %c0_29] : memref<32x256xf32, #tpu.memory_space<vmem>>, vector<3x256xf32>
      tpu.vector_store %arg7[%c18, %c0_29], %51 {strides = array<i32>} : memref<32x256xf32, #tpu.memory_space<vmem>>, vector<3x256xf32>,
      %53 = arith.index_cast %arg8 : i32 to index
      %c0_30 = arith.constant 0 : index
      %c0_31 = arith.constant 0 : index
      %c144 = arith.constant 144 : index
      %54 = vector.load %arg2[%53, %c0_30, %c0_31, %c144] : memref<2x1x3x512xbf16, #tpu.memory_space<vmem>>, vector<1x1x3x256xbf16>
      %55 = vector.shape_cast %54 : vector<1x1x3x256xbf16> to vector<3x256xbf16>
      %56 = arith.extf %55 : vector<3x256xbf16> to vector<3x256xf32>
      %c21 = arith.constant 21 : index
      %c0_32 = arith.constant 0 : index
      %57 = vector.load %arg7[%c21, %c0_32] : memref<32x256xf32, #tpu.memory_space<vmem>>, vector<3x256xf32>
      tpu.vector_store %arg7[%c21, %c0_32], %56 {strides = array<i32>} : memref<32x256xf32, #tpu.memory_space<vmem>>, vector<3x256xf32>,
      %58 = arith.index_cast %arg8 : i32 to index
      %c0_33 = arith.constant 0 : index
      %c0_34 = arith.constant 0 : index
      %c145 = arith.constant 145 : index
      %59 = vector.load %arg2[%58, %c0_33, %c0_34, %c145] : memref<2x1x3x512xbf16, #tpu.memory_space<vmem>>, vector<1x1x3x256xbf16>
      %60 = vector.shape_cast %59 : vector<1x1x3x256xbf16> to vector<3x256xbf16>
      %61 = vector.broadcast %4 : vector<1x256xbf16> to vector<3x256xbf16>
      %62 = arith.mulf %60, %61 : vector<3x256xbf16>
      %63 = arith.extf %62 : vector<3x256xbf16> to vector<3x256xf32>
      %c24 = arith.constant 24 : index
      %c0_35 = arith.constant 0 : index
      %64 = vector.load %arg7[%c24, %c0_35] : memref<32x256xf32, #tpu.memory_space<vmem>>, vector<3x256xf32>
      tpu.vector_store %arg7[%c24, %c0_35], %63 {strides = array<i32>} : memref<32x256xf32, #tpu.memory_space<vmem>>, vector<3x256xf32>,
      %c0_36 = arith.constant 0 : index
      %c0_37 = arith.constant 0 : index
      %65 = vector.load %arg7[%c0_36, %c0_37] : memref<32x256xf32, #tpu.memory_space<vmem>>, vector<32x256xf32>
      %cst_38 = arith.constant dense<0.000000e+00> : vector<32x256xf32>
      %66 = tpu.matmul %1, %65, %cst_38 {dimension_numbers = #tpu.dot_dimension_numbers<[1], [0], [0], [1], [0, 0, 1, 1], [], []>} : vector<32x32xf32>, vector<32x256xf32>, vector<32x256xf32> -> vector<32x256xf32>
      %67 = vector.broadcast %2 : vector<32x1xf32> to vector<32x256xf32>
      %68 = arith.addf %66, %67 : vector<32x256xf32>
      %cst_39 = arith.constant 0.000000e+00 : f32
      %69 = vector.broadcast %cst_39 : f32 to vector<32x256xf32>
      %70 = arith.cmpf ogt, %68, %69 : vector<32x256xf32>
      %cst_40 = arith.constant 0.00999999977 : f32
      %71 = vector.broadcast %cst_40 : f32 to vector<32x256xf32>
      %72 = arith.mulf %71, %68 : vector<32x256xf32>
      %73 = arith.select %70, %68, %72 : vector<32x256xi1>, vector<32x256xf32>
      %74 = arith.index_cast %arg8 : i32 to index
      %c0_41 = arith.constant 0 : index
      %c0_42 = arith.constant 0 : index
      %75 = vector.load %arg6[%74, %c0_41, %c0_42] : memref<2x32x256xf32, #tpu.memory_space<vmem>>, vector<1x32x256xf32>
      %76 = vector.shape_cast %75 : vector<1x32x256xf32> to vector<32x256xf32>
      %77 = vector.shape_cast %73 : vector<32x256xf32> to vector<1x32x256xf32>
      tpu.vector_store %arg6[%74, %c0_41, %c0_42], %77 {strides = array<i32>} : memref<2x32x256xf32, #tpu.memory_space<vmem>>, vector<1x32x256xf32>,
    }
    %c2_i32_7 = arith.constant 2 : i32
    return
  }
  func.func @transform_0(%arg0: i32, %arg1: i32) -> (i32, i32, i32, i32) {
    %c0_i32 = arith.constant 0 : i32
    %c0_i32_0 = arith.constant 0 : i32
    %c0_i32_1 = arith.constant 0 : i32
    return %arg0, %arg1, %c0_i32, %c0_i32_0 : i32, i32, i32, i32
  }
  func.func @transform_1(%arg0: i32, %arg1: i32) -> (i32, i32) {
    %c0_i32 = arith.constant 0 : i32
    %c0_i32_0 = arith.constant 0 : i32
    return %c0_i32, %arg1 : i32, i32
  }
  func.func @transform_2(%arg0: i32, %arg1: i32) -> (i32, i32) {
    %c0_i32 = arith.constant 0 : i32
    %c0_i32_0 = arith.constant 0 : i32
    %c0_i32_1 = arith.constant 0 : i32
    return %c0_i32, %c0_i32_0 : i32, i32
  }
  func.func @transform_3(%arg0: i32, %arg1: i32) -> (i32, i32) {
    %c0_i32 = arith.constant 0 : i32
    %c0_i32_0 = arith.constant 0 : i32
    %c0_i32_1 = arith.constant 0 : i32
    return %c0_i32, %c0_i32_0 : i32, i32
  }
  func.func @transform_4(%arg0: i32, %arg1: i32) -> (i32, i32, i32) {
    %c0_i32 = arith.constant 0 : i32
    %c0_i32_0 = arith.constant 0 : i32
    return %arg0, %c0_i32, %arg1 : i32, i32, i32
  }
}

</mosaic_0001>

<bundles_post_ra>
// kernel: input_proj.1
= control target key start
LH: loop header
LB: loop body
LE: loop exit
PB: predicated region body
PF: predicated region fallthrough
CT: control target
= control target key end

     0   :  { %s1060_s15 = smov 0   ;;  %s1062_s16 = smov 0   ;;  %s1247_s0 = inlined_call_operand.vmem [shape: bf16[4,1,3,512], index: 0, kind: input, shape index: {}]   ;;  %s1248_s1 = inlined_call_operand.vmem [shape: bf16[2,256], index: 1, kind: input, shape index: {}]   ;;  %s1249_s2 = inlined_call_operand.vmem [shape: bf16[32,32], index: 2, kind: input, shape index: {}]   ;;  %s1250_s3 = inlined_call_operand.vmem [shape: f32[32,1], index: 3, kind: input, shape index: {}]   ;;  %s1251_s4 = inlined_call_operand.vmem [shape: f32[4,32,256], index: 4, kind: output, shape index: {}]  }
   0x1   :  { %s1064_s17 = smov 0  }
   0x2 LB: > { %s26_s18 = sadd.s32 1, %s1012_s16  ;;  %p864_p0 = scmp.ge.s32.totalorder %s1016_s17, 1  ;;  %s1016_s17 = sphi %s1064_s17, %s14_s17   ;;  %s1012_s16 = sphi %s1062_s16, %s1253_s16   ;;  %s1008_s15 = sphi %s1060_s15, %s1252_s15  }
   0x3   : > { %p28_p1 = scmp.ge.s32.totalorder %s26_s18, 2  ;;  %p194_p2 = scmp.lt.s32.totalorder %s1016_s17, 3 }
   0x5   : > { %s1255_s18 = smov (%p28_p1, %s26_s18), 0  ;;  %p195_p3 = pnand %p864_p0, %p194_p2 }
   0x6   : > { %s865_s19 = sshll.u32 (!%p195_p3), %s1008_s15, 1  ;;  %s1127_s20 = smov (!%p195_p3), 0  }
   0x7   : > { %198 = sbr.rel (%p195_p3) target bundleno = 524 (0x20c), region = 36  ;;  %p235_p4 = scmp.lt.s32.totalorder (!%p195_p3), %s865_s19, 3 }
   0xc   : > { %v1081_v0 = vld [vmem:[%s1249_s2] sm:$0xff]   ;;  %v1086_v1 = vld [vmem:[%s1249_s2 + $0x8] sm:$0xff]   ;;  %v1105_v8 = vld [vmem:[%s1250_s3 + $0x10] sm:$0xff]  ;;  %v1022_v10 = vmov 0.0   ;;  %s1257_s19 = smov (!%p235_p4, %s865_s19), 3 }
   0xd   : > { %v1091_v2 = vld [vmem:[%s1250_s3] sm:$0xff]  ;;  %v888_v3 = vunpack.c.l.bf16 %v1081_v0  ;;  %v889_v4 = vunpack.c.h.bf16 %v1081_v0  ;;  %v892_v5 = vunpack.c.l.bf16 %v1086_v1  ;;  %v893_v6 = vunpack.c.h.bf16 %v1086_v1  ;;  %v1100_v7 = vld [vmem:[%s1250_s3 + $0x8] sm:$0xff]  ;;  %v1110_v9 = vld [vmem:[%s1250_s3 + $0x18] sm:$0xff]  ;;  %275 = vst [vmem:[#allocation2 + $0x20] sm:$0xf8] %v1022_v10  ;;  %s882_s8 = sshll.u32 %s1257_s19, 3 }
   0xe   : > { %276 = vst [vmem:[#allocation2 + $0x30] sm:$0xf8] %v1022_v10  ;;  %v1115_v11 = vld.sshfl [vmem:[%s1248_s1] sm:$0x11 pattern:$0x75316420]  ;;  %s1120_s12 = scalar_lea.vmem %s1247_s0, %s882_s8 }
   0xf   : > { %s883_s9 = sshll.u32 %s1257_s19, 6 }
  0x10   : > { %s1125_s15 = scalar_lea.vmem %s1251_s4, %s883_s9 }
  0x11 LB: >> { %v299_v12 = vlaneseq  ;;  %v1023_v13 = vmov 1966171168   ;;  %v1024_v16 = vmov 1983009808   ;;  %v295_v18 = vcombine.high %v1115_v11, %v1115_v11  ;;  %s884_s19 = sshll.u32 %s1020_s20, 3  ;;  %s1025_s22 = smov 15   ;;  %s1020_s20 = sphi %s1127_s20, %s282_s20  }
  0x12   : >> { %v297_v14 = vunpack.c.l.s4 %v1023_v13  ;;  %v328_v17 = vunpack.c.l.s4 %v1024_v16  ;;  %s1137_s21 = scalar_lea.vmem %s1120_s12, %s884_s19  ;;  %s1026_s23 = smov 17   ;;  %vm427_vm0 = vcmask 121856   ;;  %vm352_vm1 = vcmask 138240  }
  0x13   : >> { %v300_v15 = vshrl.u32 %v299_v12, 7  ;;  %v532_v34 = vld [vmem:[%s1137_s21 + $0x2] sm:$0x3f]  ;;  %s1027_s24 = smov 1   ;;  %s1028_s25 = smov 113   ;;  %vm458_vm2 = vcmask 7168  }
  0x14   : >> { %v298_v19 = vunpack.c.0.s8 %v297_v14  ;;  %v329_v21 = vunpack.c.0.s8 %v328_v17  ;;  %v533_v40 = vunpack.c.l.bf16 %v532_v34  ;;  %v359_v41 = vld [vmem:[%s1137_s21] sm:$0x3f]  ;;  %v534_v43 = vunpack.c.h.bf16 %v532_v34  ;;  %s1029_s26 = smov 127   ;;  %s1030_s27 = smov 111  }
  0x15   : >> { %v315_v24 = vsub.s32 0, %v300_v15  ;;  %v1143_v45 = vunpack.c.l.bf16 %v359_v41  ;;  %v361_v48 = vunpack.c.h.bf16 %v359_v41  ;;  %s1031_s28 = smov 112   ;;  %s1032_s29 = smov 16   ;;  %v503_v56 = vld [vmem:[%s1137_s21 + $0x2] sm:$0x3f]  ;;  %vm440_vm3 = vcmask 1039360  }
  0x16   : >> { %v301_v20 = vsub.s32 %v298_v19, %v300_v15  ;;  %v332_v29 = vsub.s32 %v329_v21, %v300_v15  ;;  %v537_v44 = vcombine.high %v533_v40, %v533_v40  ;;  %v540_v47 = vrot.slane %v534_v43, 3  ;;  %v554_v60 = vld [vmem:[%s1137_s21 + $0x2] sm:$0x3f]  ;;  %s885_s30 = sshll.u32 %s1020_s20, 6  ;;  %s282_s20 = sadd.s32 1, %s1020_s20  }
  0x17   : >> { %v364_v49 = vcombine.high %v1143_v45, %v1143_v45  ;;  %v538_v51 = vrot.slane %v533_v40, 3  ;;  %v367_v53 = vrot.slane %v361_v48, 5  ;;  %vm337_vm4 = vcmask 908288   ;;  %s1225_s5 = scalar_lea.vmem %s1125_s15, %s885_s30  ;;  %p279_p5 = scmp.ge.s32.totalorder %s282_s20, 2  }
  0x18   : >> { %v302_v22 = vrot.slane %v1115_v11, %v301_v20  ;;  %v309_v23 = vrot.slane %v295_v18, %v301_v20  ;;  %v539_v46 = vrot.slane %v537_v44, 3  ;;  %v436_v18 = vld [vmem:[%s1137_s21] sm:$0x3f]  ;;  %vm409_vm5 = vcmask 924672  }
  0x19   : >> { %v366_v52 = vrot.slane %v364_v49, 5  ;;  %vm547_vm6 = vcmask 916480   ;;  %vm374_vm7 = vcmask 130048   ;;  %vm608_vm8 = vcmask 261120  }
  0x1a   : >> { %v311_v25 = vpack.i.b16 %v302_v22, %v302_v22  ;;  %v318_v26 = vpack.i.b16 %v309_v23, %v309_v23  ;;  %v382_v27 = vshrl.u32 %v302_v22, 16  ;;  %v389_v28 = vshrl.u32 %v309_v23, 16  ;;  %v472_v22 = vld [vmem:[%s1137_s21 + $0x2] sm:$0x3f] }
  0x1b   : >> { %v948_v50 = vpack.i.bf16 %v540_v47, %v539_v46  ;;  %v953_v54 = vpack.i.bf16 %v367_v53, %v366_v52 }
  0x1c   : >> { %v316_v30 = vrot.slane %v311_v25, %v315_v24  ;;  %v323_v31 = vrot.slane %v318_v26, %v315_v24  ;;  %v383_v32 = vpack.i.b16 %v382_v27, %v382_v27  ;;  %v390_v33 = vpack.i.b16 %v389_v28, %v389_v28  ;;  %v286_v27 = vld [vmem:[%s1137_s21] sm:$0x3f] }
  0x1e   : >> { %v326_v35 = vcombine.low %v316_v30, %v323_v31  ;;  %v388_v36 = vrot.slane %v383_v32, %v315_v24  ;;  %v395_v37 = vrot.slane %v390_v33, %v315_v24 }
  0x20   : >> { %v333_v38 = vrot.slane %v326_v35, %v332_v29  ;;  %v398_v39 = vcombine.low %v388_v36, %v395_v37 }
  0x22   : >> { %504 = vrot.lane.b32.xlu0 %v333_v38, %s1025_s22  ;;  %v405_v42 = vrot.slane %v398_v39, %v332_v29 }
  0x24   : >> { %555 = vrot.lane.b32.xlu1 %v405_v42, %s1026_s23 }
  0x26   : >> { %473 = vrot.lane.b32.xlu0 %v405_v42, %s1027_s24 }
  0x28   : >> { %406 = vrot.lane.b32.xlu1 %v405_v42, %s1028_s25 }
  0x2a   : >> { %437 = vrot.lane.b32.xlu0 %v333_v38, %s1029_s26 }
  0x2c   : >> { %334 = vrot.lane.b32.xlu1 %v333_v38, %s1030_s27  ;;  %v381_v38 = vld [vmem:[%s1137_s21] sm:$0x3f] }
  0x2e   : >> { %949 = vrot.lane.b32.xlu0 %v948_v50, %s1031_s28 }
  0x30   : >> { %541 = vrot.lane.b32.xlu1 %v538_v51, %s1031_s28 }
  0x34   : >> { %954 = vrot.lane.b32.xlu1 %v953_v54, %s1032_s29 }
  0x94   : >> { %v505_v55 = vpop.permute.xlu0 %504 }
  0x95   : >> { %v506_v57 = vrot.slane %v505_v55, 6 }
  0x96   : >> { %v556_v58 = vpop.permute.xlu1 %555 }
  0x97   : >> { %v508_v59 = vsel %vm427_vm0, %v506_v57, %v505_v55  ;;  %v557_v61 = vrot.slane %v556_v58, 6 }
  0x98   : >> { %v510_v62 = vmul.bf16 %v508_v59, %v503_v56  ;;  %v474_v63 = vpop.permute.xlu0 %473 }
  0x99   : >> { %v559_v10 = vsel %vm352_vm1, %v557_v61, %v556_v58  ;;  %v475_v13 = vrot.slane %v474_v63, 6 }
  0x9a   : >> { %v1156_v12 = vmul.bf16 %v559_v10, %v554_v60  ;;  %v407_v14 = vpop.permute.xlu1 %406  ;;  %v511_v15 = vunpack.c.l.bf16 %v510_v62  ;;  %v512_v21 = vunpack.c.h.bf16 %v510_v62 }
  0x9b   : >> { %v477_v23 = vsel %vm458_vm2, %v475_v13, %v474_v63  ;;  %v408_v25 = vrot.slane %v407_v14, 6 }
  0x9c   : >> { %v438_v16 = vpop.permute.xlu0 %437  ;;  %v562_v17 = vunpack.c.l.bf16 %v1156_v12  ;;  %v516_v20 = vrot.slane %v511_v15, 6  ;;  %v515_v29 = vcombine.high %v511_v15, %v511_v15  ;;  %v479_v31 = vmul.bf16 %v477_v23, %v472_v22 }
  0x9d   : >> { %v439_v19 = vrot.slane %v438_v16, 6  ;;  %v518_v37 = vrot.slane %v512_v21, 6  ;;  %v410_v39 = vsel %vm409_vm5, %v408_v25, %v407_v14  ;;  %v563_v60 = vunpack.c.h.bf16 %v1156_v12 }
  0x9e   : >> { %v335_v24 = vpop.permute.xlu1 %334  ;;  %567 = vrot.lane.b32.xlu1 %v562_v17, %s1030_s27  ;;  %519 = vrot.lane.b32.xlu0 %v516_v20, %s1028_s25  ;;  %v517_v40 = vrot.slane %v515_v29, 6  ;;  %v480_v44 = vunpack.c.l.bf16 %v479_v31  ;;  %v412_v47 = vmul.bf16 %v410_v39, %v381_v38  ;;  %v566_v50 = vcombine.high %v562_v17, %v562_v17  ;;  %v465_v17 = vld [vmem:[%s1137_s21 + $0x2] sm:$0xf] }
  0x9f   : >> { %v441_v26 = vsel %vm440_vm3, %v439_v19, %v438_v16  ;;  %v336_v28 = vrot.slane %v335_v24, 6  ;;  %v481_v62 = vunpack.c.h.bf16 %v479_v31  ;;  %v365_v25 = vrot.slane %v1143_v45, 5 }
  0xa0   : >> { %v443_v30 = vmul.bf16 %v441_v26, %v436_v18  ;;  %v950_v36 = vpop.permute.xlu0 %949  ;;  %v968_v53 = vpack.i.bf16 %v518_v37, %v517_v40  ;;  %v413_v63 = vunpack.c.l.bf16 %v412_v47  ;;  %v485_v10 = vrot.slane %v480_v44, 1 }
  0xa1   : >> { %v338_v32 = vsel %vm337_vm4, %v336_v28, %v335_v24  ;;  %v952_v43 = vunpack.i.h.bf16 %v950_v36  ;;  %v951_v46 = vunpack.i.l.bf16 %v950_v36  ;;  %v963_v14 = vpack.i.bf16 %v563_v60, %v566_v50 }
  0xa2   : >> { %v444_v33 = vunpack.c.l.bf16 %v443_v30  ;;  %v340_v34 = vmul.bf16 %v338_v32, %v286_v27  ;;  %v542_v35 = vpop.permute.xlu1 %541  ;;  %v445_v52 = vunpack.c.h.bf16 %v443_v30  ;;  %v484_v16 = vcombine.high %v480_v44, %v480_v44 }
  0xa3   : >> { %v548_v58 = vsel %vm547_vm6, %v542_v35, %v951_v46  ;;  %v549_v59 = vsel %vm547_vm6, %v951_v46, %v952_v43  ;;  %v466_v18 = vunpack.c.l.bf16 %v465_v17  ;;  %v487_v12 = vrot.slane %v481_v62, 1 }
  0xa4   : >> { %v341_v41 = vunpack.c.l.bf16 %v340_v34  ;;  %v449_v42 = vrot.slane %v444_v33, 7  ;;  %v342_v48 = vunpack.c.h.bf16 %v340_v34  ;;  %v448_v54 = vcombine.high %v444_v33, %v444_v33  ;;  %552 = vst [vmem:[#allocation2 + $0x18] sm:$0xe0] %v548_v58  ;;  %553 = vst [vmem:[#allocation2 + $0x28] sm:$0xe0] %v549_v59 }
  0xa5   : >> { %v451_v13 = vrot.slane %v445_v52, 7  ;;  %471 = vst [vmem:[#allocation2 + $0x10] sm:$0x70] %v466_v18  ;;  %v468_v19 = vcombine.low %v466_v18, %v466_v18  ;;  %v418_v21 = vrot.slane %v413_v63, 2  ;;  %v486_v22 = vrot.slane %v484_v16, 1 }
  0xa6   : >> { %452 = vrot.lane.b32.xlu1 %v449_v42, %s1027_s24  ;;  %v345_v49 = vcombine.high %v341_v41, %v341_v41  ;;  %v1170_v51 = vpop.permute.xlu1 %954  ;;  %v450_v15 = vrot.slane %v448_v54, 7  ;;  %v417_v23 = vcombine.high %v413_v63, %v413_v63  ;;  %v414_v24 = vunpack.c.h.bf16 %v412_v47 }
  0xa7   : >> { %v957_v55 = vunpack.i.h.bf16 %v1170_v51  ;;  %v956_v57 = vunpack.i.l.bf16 %v1170_v51  ;;  %470 = vst [vmem:[#allocation2 + $0x38] sm:$0x70] %v468_v19  ;;  %v978_v26 = vpack.i.bf16 %v487_v12, %v486_v22  ;;  %v1033_v30 = vmov 0.0  }
  0xa8   : >> { %v958_v56 = vpack.i.bf16 %v342_v48, %v345_v49  ;;  %v973_v20 = vpack.i.bf16 %v451_v13, %v450_v15  ;;  %v419_v27 = vrot.slane %v417_v23, 2  ;;  %v420_v28 = vrot.slane %v414_v24, 2  ;;  %685 = vmatprep.mubr.f32.mxu0 %v1033_v30  ;;  %697 = vmatprep.mubr.f32.mxu1 %v1033_v30 }
  0xa9   : >> { %v376_v61 = vsel %vm374_vm7, %v956_v57, %v957_v55  ;;  %v1034_v31 = vmov 0  }
  0xaa   : >> { %969 = vrot.lane.b32.xlu1 %v968_v53, %s1028_s25  ;;  %959 = vrot.lane.b32.xlu0 %v958_v56, %s1026_s23  ;;  %380 = vst [vmem:[#allocation2] sm:$0x38] %v376_v61  ;;  %v983_v29 = vpack.i.bf16 %v420_v28, %v419_v27 }
  0xab   : >> { %989 = vset.pattern.permute.xlu1 %v1034_v31  ;;  %988 = vset.pattern.permute.xlu0 %v1034_v31 }
  0xae   : >> { %488 = vrot.lane.b32.xlu1 %v485_v10, %s1029_s26  ;;  %964 = vrot.lane.b32.xlu0 %v963_v14, %s1030_s27 }
  0xb2   : >> { %974 = vrot.lane.b32.xlu1 %v973_v20, %s1027_s24  ;;  %421 = vrot.lane.b32.xlu0 %v418_v21, %s1025_s22 }
  0xb6   : >> { %368 = vrot.lane.b32.xlu1 %v365_v25, %s1032_s29  ;;  %979 = vrot.lane.b32.xlu0 %v978_v26, %s1029_s26 }
  0xba   : >> { %984 = vrot.lane.b32.xlu0 %v983_v29, %s1025_s22  ;;  %595 = vperm.xlu1 %989, %v1100_v7  }
  0xbe   : >> { %346 = vrot.lane.b32.xlu0 %v341_v41, %s1026_s23  ;;  %600 = vperm.xlu1 %989, %v1105_v8  }
  0xc2   : >> { %590 = vperm.xlu0 %988, %v1091_v2  }
  0xc6   : >> { %605 = vperm.xlu0 %988, %v1110_v9  }
 0x110   : >> { %v568_v45 = vpop.permute.xlu1 %567  ;;  %v520_v32 = vpop.permute.xlu0 %519 }
 0x118   : >> { %v453_v33 = vpop.permute.xlu1 %452 }
 0x11c   : >> { %v970_v34 = vpop.permute.xlu1 %969  ;;  %v960_v35 = vpop.permute.xlu0 %959 }
 0x11d   : >> { %v972_v36 = vunpack.i.h.bf16 %v970_v34  ;;  %v971_v37 = vunpack.i.l.bf16 %v970_v34  ;;  %v962_v38 = vunpack.i.h.bf16 %v960_v35  ;;  %v961_v39 = vunpack.i.l.bf16 %v960_v35 }
 0x11f   : >> { %v526_v40 = vsel %vm409_vm5, %v520_v32, %v971_v37  ;;  %v527_v41 = vsel %vm409_vm5, %v971_v37, %v972_v36  ;;  %v354_v42 = vsel %vm352_vm1, %v961_v39, %v962_v38 }
 0x120   : >> { %530 = vst [vmem:[#allocation2 + $0x18] sm:$0x1c] %v526_v40  ;;  %531 = vst [vmem:[#allocation2 + $0x28] sm:$0x1c] %v527_v41  ;;  %v489_v43 = vpop.permute.xlu1 %488  ;;  %v965_v44 = vpop.permute.xlu0 %964 }
 0x121   : >> { %358 = vst [vmem:[#allocation2] sm:$0x7] %v354_v42  ;;  %v967_v46 = vunpack.i.h.bf16 %v965_v44  ;;  %v966_v47 = vunpack.i.l.bf16 %v965_v44 }
 0x123   : >> { %v574_v48 = vsel %vm337_vm4, %v568_v45, %v966_v47  ;;  %v575_v49 = vsel %vm337_vm4, %v966_v47, %v967_v46 }
 0x124   : >> { %578 = vst [vmem:[#allocation2 + $0x20] sm:$0x7] %v574_v48  ;;  %579 = vst [vmem:[#allocation2 + $0x30] sm:$0x7] %v575_v49  ;;  %v975_v50 = vpop.permute.xlu1 %974  ;;  %v422_v52 = vpop.permute.xlu0 %421 }
 0x125   : >> { %v977_v53 = vunpack.i.h.bf16 %v975_v50  ;;  %v976_v54 = vunpack.i.l.bf16 %v975_v50 }
 0x127   : >> { %v459_v55 = vsel %vm458_vm2, %v453_v33, %v976_v54  ;;  %v460_v56 = vsel %vm458_vm2, %v976_v54, %v977_v53 }
 0x128   : >> { %463 = vst [vmem:[#allocation2 + $0x38] sm:$0xe] %v459_v55  ;;  %464 = vst [vmem:[#allocation2 + $0x10] sm:$0xe] %v460_v56  ;;  %v369_v58 = vpop.permute.xlu1 %368  ;;  %v980_v59 = vpop.permute.xlu0 %979 }
 0x129   : >> { %v375_v60 = vsel %vm374_vm7, %v369_v58, %v956_v57  ;;  %v982_v61 = vunpack.i.h.bf16 %v980_v59  ;;  %v981_v62 = vunpack.i.l.bf16 %v980_v59 }
 0x12a   : >> { %379 = vst [vmem:[#allocation2 + $0x8] sm:$0x38] %v375_v60 }
 0x12b   : >> { %v495_v63 = vsel %vm440_vm3, %v489_v43, %v981_v62  ;;  %v496_v10 = vsel %vm440_vm3, %v981_v62, %v982_v61  ;;  %v587_v13 = vld [vmem:[#allocation2 + $0x30] sm:$0xff]  ;;  %v586_v14 = vld [vmem:[#allocation2 + $0x20] sm:$0xff] }
 0x12c   : >> { %499 = vst [vmem:[#allocation2 + $0x18] ss:$36 sps:$4 sm:$0x83] %v495_v63   ;;  %500 = vst [vmem:[#allocation2 + $0x28] ss:$-20 sps:$4 sm:$0x83] %v496_v10   ;;  %v985_v15 = vpop.permute.xlu0 %984  ;;  %645 = vmatprep.subr.mxu0 %v587_v13  ;;  %895 = vmatprep.subr.mxu1 %v587_v13 }
 0x12d   : >> { %v987_v16 = vunpack.i.h.bf16 %v985_v15  ;;  %v986_v17 = vunpack.i.l.bf16 %v985_v15  ;;  %646 = vmatpush1.msra.mxu0 %v586_v14  ;;  %899 = vmatpush1.msra.mxu1 %v586_v14 }
 0x12f   : >> { %v428_v51 = vsel %vm427_vm0, %v422_v52, %v986_v17  ;;  %v429_v57 = vsel %vm427_vm0, %v986_v17, %v987_v16 }
 0x130   : >> { %432 = vst [vmem:[#allocation2 + $0x38] ss:$-44 sps:$4 sm:$0xc1] %v428_v51   ;;  %433 = vst [vmem:[#allocation2 + $0x10] ss:$-12 sps:$4 sm:$0xc1] %v429_v57   ;;  %v347_v18 = vpop.permute.xlu0 %346 }
 0x131   : >> { %v353_v12 = vsel %vm352_vm1, %v347_v18, %v961_v39 }
 0x132   : >> { %357 = vst [vmem:[#allocation2 + $0x8] sm:$0x7] %v353_v12 }
 0x133   : >> { %v585_v19 = vld [vmem:[#allocation2 + $0x28] sm:$0xff]  ;;  %v584_v20 = vld [vmem:[#allocation2 + $0x18] sm:$0xff] }
 0x134   : >> { %647 = vmatprep.subr.mxu0 %v585_v19  ;;  %896 = vmatprep.subr.mxu1 %v585_v19 }
 0x135   : >> { %648 = vmatpush1.msra.mxu0 %v584_v20  ;;  %900 = vmatpush1.msra.mxu1 %v584_v20  ;;  %v596_v25 = vpop.permute.xlu1 %595 }
 0x137   : >> { %v583_v21 = vld [vmem:[#allocation2 + $0x10] sm:$0xff]  ;;  %v582_v22 = vld [vmem:[#allocation2 + $0x38] sm:$0xff]  ;;  %v581_v23 = vld [vmem:[#allocation2] sm:$0xff] }
 0x138   : >> { %649 = vmatprep.subr.mxu0 %v583_v21  ;;  %897 = vmatprep.subr.mxu1 %v583_v21 }
 0x139   : >> { %650 = vmatpush1.msra.mxu0 %v582_v22  ;;  %901 = vmatpush1.msra.mxu1 %v582_v22  ;;  %v580_v24 = vld [vmem:[#allocation2 + $0x8] sm:$0xff]  ;;  %v601_v27 = vpop.permute.xlu1 %600 }
 0x13a   : >> { %651 = vmatprep.subr.mxu0 %v581_v23  ;;  %898 = vmatprep.subr.mxu1 %v581_v23 }
 0x13b   : >> { %652 = vmatpush1.msra.mxu0 %v580_v24  ;;  %902 = vmatpush1.msra.mxu1 %v580_v24 }
 0x13c   : >> { %874 = vmatmul.mubr.msk.f32.vlgmr.msra.gmra.mxu0 %vm608_vm8, %v888_v3  ;;  %876 = vmatmul.mubr.msk.f32.vlgmr.msra.gmra.mxu1 %vm608_vm8, %v892_v5 }
 0x13d   : >> { %691 = vmatprep.mubr.f32.mxu0 %v1033_v30  ;;  %703 = vmatprep.mubr.f32.mxu1 %v1033_v30  ;;  %v591_v26 = vpop.permute.xlu0 %590 }
 0x140   : >> { %875 = vmatmul.mubr.msk.f32.gmra.mxu0 %vm608_vm8, %v889_v4  ;;  %877 = vmatmul.mubr.msk.f32.gmra.mxu1 %vm608_vm8, %v893_v6 }
 0x141   : >> { %v606_v35 = vpop.permute.xlu0 %605 }
 0x1fc   : >> { %v687_v28 = vpop.f32.mrf.mxu0  ;;  %v699_v29 = vpop.f32.mrf.mxu1 }
 0x1fd   : >> { %v688_v31 = vadd.f32 %v687_v28, %v591_v26  ;;  %v700_v45 = vadd.f32 %v699_v29, %v601_v27 }
 0x1fe   : >> { %v689_v32 = vpop.f32.mrf.mxu0  ;;  %v701_v33 = vpop.f32.mrf.mxu1 }
 0x1ff   : >> { %vm710_vm9 = vcmp.gt.f32.partialorder %v688_v31, 0.0  ;;  %v718_v34 = vmul.f32 0.01, %v688_v31  ;;  %vm714_vm10 = vcmp.gt.f32.partialorder %v700_v45, 0.0  ;;  %v722_v30 = vmul.f32 0.01, %v700_v45 }
 0x200   : >> { %v690_v36 = vadd.f32 %v689_v32, %v591_v26  ;;  %v702_v37 = vadd.f32 %v701_v33, %v601_v27  ;;  %v693_v38 = vpop.f32.mrf.mxu0  ;;  %v705_v39 = vpop.f32.mrf.mxu1 }
 0x201   : >> { %v726_v40 = vsel %vm710_vm9, %v688_v31, %v718_v34  ;;  %v730_v41 = vsel %vm714_vm10, %v700_v45, %v722_v30  ;;  %v694_v42 = vadd.f32 %v693_v38, %v596_v25  ;;  %v706_v43 = vadd.f32 %v705_v39, %v606_v35 }
 0x202   : >> { %737 = vst [vmem:[%s1225_s5] sm:$0xff] %v726_v40  ;;  %741 = vst [vmem:[%s1225_s5 + $0x20] sm:$0xff] %v730_v41  ;;  %vm711_vm11 = vcmp.gt.f32.partialorder %v690_v36, 0.0  ;;  %v719_v44 = vmul.f32 0.01, %v690_v36  ;;  %vm715_vm12 = vcmp.gt.f32.partialorder %v702_v37, 0.0  ;;  %v695_v47 = vpop.f32.mrf.mxu0  ;;  %v707_v48 = vpop.f32.mrf.mxu1 }
 0x203   : >> { %v723_v46 = vmul.f32 0.01, %v702_v37  ;;  %vm712_vm13 = vcmp.gt.f32.partialorder %v694_v42, 0.0  ;;  %v720_v49 = vmul.f32 0.01, %v694_v42  ;;  %vm716_vm14 = vcmp.gt.f32.partialorder %v706_v43, 0.0 }
 0x204   : >> { %v724_v50 = vmul.f32 0.01, %v706_v43  ;;  %v727_v52 = vsel %vm711_vm11, %v690_v36, %v719_v44  ;;  %v696_v54 = vadd.f32 %v695_v47, %v596_v25  ;;  %v708_v55 = vadd.f32 %v707_v48, %v606_v35 }
 0x205   : >> { %v731_v53 = vsel %vm715_vm12, %v702_v37, %v723_v46  ;;  %738 = vst [vmem:[%s1225_s5 + $0x8] sm:$0xff] %v727_v52  ;;  %v728_v56 = vsel %vm712_vm13, %v694_v42, %v720_v49 }
 0x206   : >> { %742 = vst [vmem:[%s1225_s5 + $0x28] sm:$0xff] %v731_v53  ;;  %v732_v58 = vsel %vm716_vm14, %v706_v43, %v724_v50  ;;  %739 = vst [vmem:[%s1225_s5 + $0x10] sm:$0xff] %v728_v56  ;;  %vm713_vm15 = vcmp.gt.f32.partialorder %v696_v54, 0.0  ;;  %v721_v59 = vmul.f32 0.01, %v696_v54  ;;  %vm717_vm0 = vcmp.gt.f32.partialorder %v708_v55, 0.0 }
 0x207   : >> { %743 = vst [vmem:[%s1225_s5 + $0x30] sm:$0xff] %v732_v58  ;;  %v725_v60 = vmul.f32 0.01, %v708_v55  ;;  %281 = sbr.rel (!%p279_p5) target bundleno = 17 (0x11), region = 78 }
 0x208   : >> { %v729_v61 = vsel %vm713_vm15, %v696_v54, %v721_v59 }
 0x209   : >> { %v733_v62 = vsel %vm717_vm0, %v708_v55, %v725_v60  ;;  %740 = vst [vmem:[%s1225_s5 + $0x18] sm:$0xff] %v729_v61 }
 0x20a   : >> { %744 = vst [vmem:[%s1225_s5 + $0x38] sm:$0xff] %v733_v62 }
 0x20c PF: > { %s14_s17 = sadd.s32 1, %s1016_s17   ;;  %s1252_s15 = smov %s1012_s16 }
 0x20d   : > { %p11_p6 = scmp.ge.s32.totalorder %s14_s17, 4   ;;  %s1253_s16 = smov %s1255_s18 }
 0x20f   :  { %13 = sbr.rel (!%p11_p6) target bundleno = 2 (0x2), region = 89 }

</bundles_post_ra>
